<compile_context>
chip_gen: v7x
topology: tpu7x:2x2x1
jax: 0.10.0
libtpu: 0.0.40
codegen_flags: <defaults>
</compile_context>

<pallas_src>
import jax
import jax.numpy as jnp
from jax.experimental import pallas as pl
from jax.experimental.pallas import tpu as pltpu


def _scale_mul_kernel(scale_ref, x_ref, o_ref):
    # scale_ref: (TILE_NC, 1) in its native dtype; x_ref: (TILE_NC, HW).
    # Lane-broadcast multiply on the VPU; jnp promotion (f32*bf16 -> f32)
    # matches the PyTorch reference, then cast to the output dtype on store.
    o_ref[...] = (scale_ref[...] * x_ref[...]).astype(o_ref.dtype)


def channel_scale_mul(x100, x95, vmem_budget_bytes=4 << 20):
    """Computes x100 * x95 where x100 is (N, C, 1, 1) and x95 is (N, C, H, W)."""
    n, c, h, w = x95.shape
    assert x100.shape == (n, c, 1, 1)

    nc = n * c
    hw = h * w

    out_dtype = jnp.result_type(x100.dtype, x95.dtype)

    x2d = x95.reshape(nc, hw)
    s2d = x100.reshape(nc, 1)  # native dtype -- no wrapper-side cast

    x_bytes = x95.dtype.itemsize
    o_bytes = jnp.dtype(out_dtype).itemsize
    s_bytes = x100.dtype.itemsize

    # Sublane quantum: 8 rows for 32-bit dtypes, 16 for 16-bit (packed) dtypes.
    sub = 8
    for nbytes in (x_bytes, o_bytes, s_bytes):
        if nbytes == 2:
            sub = 16

    nc_ceil = pl.cdiv(nc, sub) * sub  # upper bound on the tile (rounded to sub)

    # VMEM-budget-driven tile: 2x double-buffered x-in blocks + 2x out blocks
    # dominate; the (tile,1) scale column lane-pads to 128 lanes per buffer.
    bytes_per_row = 2 * hw * x_bytes + 2 * hw * o_bytes + 2 * 128 * s_bytes
    tile = (vmem_budget_bytes // bytes_per_row) // sub * sub
    tile = max(sub, min(tile, nc_ceil))

    # v7x megacore: only when the tensor is big enough to be bandwidth-bound,
    # ensure >= 2 grid steps along the "parallel" NC axis so the second
    # TensorCore takes half the HBM traffic.  Skipped at overhead-bound sizes.
    if nc * hw * (x_bytes + o_bytes) >= (4 << 20):
        half = pl.cdiv(pl.cdiv(nc, 2), sub) * sub
        tile = min(tile, max(sub, half))

    grid = (pl.cdiv(nc, tile),)  # ragged tail handled by edge-block masking

    cost = pl.CostEstimate(
        flops=nc * hw,
        transcendentals=0,
        bytes_accessed=nc * hw * (x_bytes + o_bytes) + nc * s_bytes,
    )

    out2d = pl.pallas_call(
        _scale_mul_kernel,
        out_shape=jax.ShapeDtypeStruct((nc, hw), out_dtype),
        grid=grid,
        in_specs=[
            pl.BlockSpec((tile, 1), lambda i: (i, 0)),
            pl.BlockSpec((tile, hw), lambda i: (i, 0)),
        ],
        out_specs=pl.BlockSpec((tile, hw), lambda i: (i, 0)),
        compiler_params=pltpu.CompilerParams(
            dimension_semantics=("parallel",),
        ),
        cost_estimate=cost,
    )(s2d, x2d)

    return out2d.reshape(n, c, h, w)


if __name__ == "__main__":
    key = jax.random.PRNGKey(0)
    k1, k2 = jax.random.split(key)

    # Shapes implied by the module's forward: x100=(1,320,1,1), x95=(1,320,14,14)
    x100 = jax.random.normal(k1, (1, 320, 1, 1), dtype=jnp.float32)
    x95 = jax.random.normal(k2, (1, 320, 14, 14), dtype=jnp.float32)

    out = channel_scale_mul(x100, x95)
    jax.block_until_ready(out)

    # sanity check against plain JAX broadcasting (same semantics as torch mul)
    ref = x100 * x95
    assert out.shape == ref.shape
    assert out.dtype == ref.dtype
    assert jnp.allclose(out, ref, atol=1e-6, rtol=1e-6)

    print("KERNEL_OK")
</pallas_src>

<mosaic_0001>
module attributes {stable_mosaic.version = 11 : i64} {
  func.func @_scale_mul_kernel(%arg0: i32, %arg1: memref<320x1xf32, #tpu.memory_space<vmem>>, %arg2: memref<320x196xf32, #tpu.memory_space<vmem>>, %arg3: memref<320x196xf32, #tpu.memory_space<vmem>>) attributes {dimension_semantics = [#tpu.dimension_semantics<parallel>], iteration_bounds = array<i64: 1>, scalar_prefetch = 0 : i64, scratch_operands = 0 : i64, tpu.core_type = #tpu.core_type<tc>, window_params = [{transform_indices = @transform_0, window_bounds = array<i64: 320, 1>}, {transform_indices = @transform_1, window_bounds = array<i64: 320, 196>}, {transform_indices = @transform_2, window_bounds = array<i64: 320, 196>}]} {
    %c0 = arith.constant 0 : index
    %c0_0 = arith.constant 0 : index
    %0 = vector.load %arg1[%c0, %c0_0] : memref<320x1xf32, #tpu.memory_space<vmem>>, vector<320x1xf32>
    %c0_1 = arith.constant 0 : index
    %c0_2 = arith.constant 0 : index
    %1 = vector.load %arg2[%c0_1, %c0_2] : memref<320x196xf32, #tpu.memory_space<vmem>>, vector<320x196xf32>
    %2 = vector.broadcast %0 : vector<320x1xf32> to vector<320x196xf32>
    %3 = arith.mulf %2, %1 : vector<320x196xf32>
    %c0_3 = arith.constant 0 : index
    %c0_4 = arith.constant 0 : index
    %4 = vector.load %arg3[%c0_3, %c0_4] : memref<320x196xf32, #tpu.memory_space<vmem>>, vector<320x196xf32>
    tpu.vector_store %arg3[%c0_3, %c0_4], %3 {strides = array<i32>} : memref<320x196xf32, #tpu.memory_space<vmem>>, vector<320x196xf32>,
    return
  }
  func.func @transform_0(%arg0: i32) -> (i32, i32) {
    %c0_i32 = arith.constant 0 : i32
    %c0_i32_0 = arith.constant 0 : i32
    return %arg0, %c0_i32 : i32, i32
  }
  func.func @transform_1(%arg0: i32) -> (i32, i32) {
    %c0_i32 = arith.constant 0 : i32
    %c0_i32_0 = arith.constant 0 : i32
    return %arg0, %c0_i32 : i32, i32
  }
  func.func @transform_2(%arg0: i32) -> (i32, i32) {
    %c0_i32 = arith.constant 0 : i32
    %c0_i32_0 = arith.constant 0 : i32
    return %arg0, %c0_i32 : i32, i32
  }
}

</mosaic_0001>

<bundles_post_ra>
// kernel: tpu_custom_call.1
= control target key start
LH: loop header
LB: loop body
LE: loop exit
PB: predicated region body
PF: predicated region fallthrough
CT: control target
= control target key end

     0   :  { %v499_v0 = vmov 0   ;;  %vm412_vm0 = vcmask 556032   ;;  %s1155_s0 = inlined_call_operand.vmem [shape: f32[320,1], index: 0, kind: input, shape index: {}]   ;;  %s1156_s1 = inlined_call_operand.vmem [shape: f32[320,196], index: 1, kind: input, shape index: {}]   ;;  %s1157_s2 = inlined_call_operand.vmem [shape: f32[320,196], index: 2, kind: output, shape index: {}]  }
   0x1   :  { %498 = vset.pattern.permute.xlu1 %v499_v0  ;;  %497 = vset.pattern.permute.xlu0 %v499_v0  ;;  %v13_v1 = vld [vmem:[%s1155_s0 + $0x10] sm:$0xff]  ;;  %v11_v2 = vld [vmem:[%s1155_s0] sm:$0xff]  ;;  %v14_v3 = vld [vmem:[%s1155_s0 + $0x18] sm:$0xff] }
   0x2   :  { %143 = vperm.xlu1 %498, %v13_v1   ;;  %133 = vperm.xlu0 %497, %v11_v2   ;;  %v12_v4 = vld [vmem:[%s1155_s0 + $0x8] sm:$0xff]  ;;  %v15_v6 = vld [vmem:[%s1155_s0 + $0x20] sm:$0xff]  ;;  %v18_v7 = vld [vmem:[%s1155_s0 + $0x38] sm:$0xff] }
   0x3   :  { %v16_v5 = vld [vmem:[%s1155_s0 + $0x28] sm:$0xff]  ;;  %v17_v8 = vld [vmem:[%s1155_s0 + $0x30] sm:$0xff]  ;;  %v19_v10 = vld [vmem:[%s1155_s0 + $0x40] sm:$0xff] }
   0x4   :  { %v20_v9 = vld [vmem:[%s1155_s0 + $0x48] sm:$0xff]  ;;  %v22_v11 = vld [vmem:[%s1155_s0 + $0x58] sm:$0xff]  ;;  %v21_v12 = vld [vmem:[%s1155_s0 + $0x50] sm:$0xff] }
   0x5   :  { %v24_v13 = vld [vmem:[%s1155_s0 + $0x68] sm:$0xff]  ;;  %v23_v14 = vld [vmem:[%s1155_s0 + $0x60] sm:$0xff]  ;;  %v26_v15 = vld [vmem:[%s1155_s0 + $0x78] sm:$0xff] }
   0x6   :  { %148 = vperm.xlu1 %498, %v14_v3   ;;  %138 = vperm.xlu0 %497, %v12_v4   ;;  %v25_v16 = vld [vmem:[%s1155_s0 + $0x70] sm:$0xff]  ;;  %v28_v17 = vld [vmem:[%s1155_s0 + $0x88] sm:$0xff]  ;;  %v27_v18 = vld [vmem:[%s1155_s0 + $0x80] sm:$0xff] }
   0x7   :  { %v30_v19 = vld [vmem:[%s1155_s0 + $0x98] sm:$0xff]  ;;  %v29_v20 = vld [vmem:[%s1155_s0 + $0x90] sm:$0xff]  ;;  %v32_v21 = vld [vmem:[%s1155_s0 + $0xa8] sm:$0xff] }
   0x8   :  { %v31_v22 = vld [vmem:[%s1155_s0 + $0xa0] sm:$0xff]  ;;  %v34_v23 = vld [vmem:[%s1155_s0 + $0xb8] sm:$0xff]  ;;  %v33_v24 = vld [vmem:[%s1155_s0 + $0xb0] sm:$0xff] }
   0x9   :  { %v36_v25 = vld [vmem:[%s1155_s0 + $0xc8] sm:$0xff]  ;;  %v35_v26 = vld [vmem:[%s1155_s0 + $0xc0] sm:$0xff]  ;;  %v38_v27 = vld [vmem:[%s1155_s0 + $0xd8] sm:$0xff] }
   0xa   :  { %158 = vperm.xlu1 %498, %v16_v5   ;;  %153 = vperm.xlu0 %497, %v15_v6   ;;  %v37_v28 = vld [vmem:[%s1155_s0 + $0xd0] sm:$0xff]  ;;  %v40_v29 = vld [vmem:[%s1155_s0 + $0xe8] sm:$0xff]  ;;  %v39_v30 = vld [vmem:[%s1155_s0 + $0xe0] sm:$0xff] }
   0xb   :  { %v42_v31 = vld [vmem:[%s1155_s0 + $0xf8] sm:$0xff]  ;;  %v41_v32 = vld [vmem:[%s1155_s0 + $0xf0] sm:$0xff]  ;;  %v44_v33 = vld [vmem:[%s1155_s0 + $0x108] sm:$0xff] }
   0xc   :  { %v43_v34 = vld [vmem:[%s1155_s0 + $0x100] sm:$0xff]  ;;  %v46_v35 = vld [vmem:[%s1155_s0 + $0x118] sm:$0xff]  ;;  %v45_v36 = vld [vmem:[%s1155_s0 + $0x110] sm:$0xff] }
   0xd   :  { %v48_v37 = vld [vmem:[%s1155_s0 + $0x128] sm:$0xff]  ;;  %v47_v38 = vld [vmem:[%s1155_s0 + $0x120] sm:$0xff]  ;;  %v50_v39 = vld [vmem:[%s1155_s0 + $0x138] sm:$0xff] }
   0xe   :  { %168 = vperm.xlu1 %498, %v18_v7   ;;  %163 = vperm.xlu0 %497, %v17_v8   ;;  %v49_v40 = vld [vmem:[%s1155_s0 + $0x130] sm:$0xff]  ;;  %v55_v41 = vld [vmem:[%s1156_s1 + $0x20] sm:$0xff]  ;;  %v56_v42 = vld [vmem:[%s1156_s1 + $0x28] sm:$0xff] }
   0xf   :  { %v51_v43 = vld [vmem:[%s1156_s1] sm:$0xff]  ;;  %v52_v44 = vld [vmem:[%s1156_s1 + $0x8] sm:$0xff]  ;;  %v57_v51 = vld [vmem:[%s1156_s1 + $0x30] sm:$0xff] }
  0x10   :  { %v58_v52 = vld [vmem:[%s1156_s1 + $0x38] sm:$0xff]  ;;  %v53_v53 = vld [vmem:[%s1156_s1 + $0x10] sm:$0xff]  ;;  %v59_v63 = vld [vmem:[%s1156_s1 + $0x40] sm:$0xff] }
  0x11   :  { %v54_v54 = vld [vmem:[%s1156_s1 + $0x18] sm:$0xff]  ;;  %v61_v61 = vld [vmem:[%s1156_s1 + $0x50] sm:$0xff]  ;;  %v60_v0 = vld [vmem:[%s1156_s1 + $0x48] sm:$0xff] }
  0x12   :  { %178 = vperm.xlu1 %498, %v20_v9   ;;  %173 = vperm.xlu0 %497, %v19_v10   ;;  %v62_v62 = vld [vmem:[%s1156_s1 + $0x58] sm:$0xff]  ;;  %v65_v7 = vld [vmem:[%s1156_s1 + $0x70] sm:$0xff]  ;;  %v63_v9 = vld [vmem:[%s1156_s1 + $0x60] sm:$0xff] }
  0x13   :  { %v66_v8 = vld [vmem:[%s1156_s1 + $0x78] sm:$0xff]  ;;  %v64_v10 = vld [vmem:[%s1156_s1 + $0x68] sm:$0xff] }
  0x16   :  { %188 = vperm.xlu1 %498, %v22_v11   ;;  %183 = vperm.xlu0 %497, %v21_v12  }
  0x1a   :  { %198 = vperm.xlu1 %498, %v24_v13   ;;  %193 = vperm.xlu0 %497, %v23_v14  }
  0x1e   :  { %208 = vperm.xlu1 %498, %v26_v15   ;;  %203 = vperm.xlu0 %497, %v25_v16  }
  0x22   :  { %218 = vperm.xlu1 %498, %v28_v17   ;;  %213 = vperm.xlu0 %497, %v27_v18   ;;  %v69_v17 = vld [vmem:[%s1156_s1 + $0x90] sm:$0xff]  ;;  %v70_v18 = vld [vmem:[%s1156_s1 + $0x98] sm:$0xff] }
  0x26   :  { %228 = vperm.xlu1 %498, %v30_v19   ;;  %223 = vperm.xlu0 %497, %v29_v20   ;;  %v67_v19 = vld [vmem:[%s1156_s1 + $0x80] sm:$0xff]  ;;  %v68_v20 = vld [vmem:[%s1156_s1 + $0x88] sm:$0xff] }
  0x2a   :  { %238 = vperm.xlu1 %498, %v32_v21   ;;  %233 = vperm.xlu0 %497, %v31_v22  }
  0x2e   :  { %248 = vperm.xlu1 %498, %v34_v23   ;;  %243 = vperm.xlu0 %497, %v33_v24  }
  0x32   :  { %258 = vperm.xlu1 %498, %v36_v25   ;;  %253 = vperm.xlu0 %497, %v35_v26  }
  0x36   :  { %268 = vperm.xlu1 %498, %v38_v27   ;;  %263 = vperm.xlu0 %497, %v37_v28   ;;  %v73_v27 = vld [vmem:[%s1156_s1 + $0xb0] sm:$0xff]  ;;  %v74_v28 = vld [vmem:[%s1156_s1 + $0xb8] sm:$0xff] }
  0x3a   :  { %278 = vperm.xlu1 %498, %v40_v29   ;;  %273 = vperm.xlu0 %497, %v39_v30   ;;  %v71_v29 = vld [vmem:[%s1156_s1 + $0xa0] sm:$0xff]  ;;  %v72_v30 = vld [vmem:[%s1156_s1 + $0xa8] sm:$0xff] }
  0x3e   :  { %288 = vperm.xlu1 %498, %v42_v31   ;;  %283 = vperm.xlu0 %497, %v41_v32  }
  0x42   :  { %298 = vperm.xlu1 %498, %v44_v33   ;;  %293 = vperm.xlu0 %497, %v43_v34  }
  0x46   :  { %308 = vperm.xlu1 %498, %v46_v35   ;;  %303 = vperm.xlu0 %497, %v45_v36  }
  0x4a   :  { %318 = vperm.xlu1 %498, %v48_v37   ;;  %313 = vperm.xlu0 %497, %v47_v38   ;;  %v77_v37 = vld [vmem:[%s1156_s1 + $0xd0] sm:$0xff]  ;;  %v78_v38 = vld [vmem:[%s1156_s1 + $0xd8] sm:$0xff] }
  0x4e   :  { %328 = vperm.xlu1 %498, %v50_v39   ;;  %323 = vperm.xlu0 %497, %v49_v40   ;;  %v75_v39 = vld [vmem:[%s1156_s1 + $0xc0] sm:$0xff]  ;;  %v76_v40 = vld [vmem:[%s1156_s1 + $0xc8] sm:$0xff] }
  0x81   :  { %v144_v45 = vpop.permute.xlu1 %143  ;;  %v134_v46 = vpop.permute.xlu0 %133 }
  0x82   :  { %v335_v47 = vmul.f32 %v144_v45, %v55_v41  ;;  %v336_v48 = vmul.f32 %v144_v45, %v56_v42  ;;  %v331_v49 = vmul.f32 %v134_v46, %v51_v43  ;;  %v332_v50 = vmul.f32 %v134_v46, %v52_v44 }
  0x84   :  { %416 = vst [vmem:[%s1157_s2 + $0x20] sm:$0xff] %v335_v47  ;;  %417 = vst.msk [vmem:[%s1157_s2 + $0x28] sm:$0xff] %vm412_vm0, %v336_v48  ;;  %v81_v47 = vld [vmem:[%s1156_s1 + $0xf0] sm:$0xff]  ;;  %v82_v48 = vld [vmem:[%s1156_s1 + $0xf8] sm:$0xff] }
  0x85   :  { %411 = vst [vmem:[%s1157_s2] sm:$0xff] %v331_v49  ;;  %413 = vst.msk [vmem:[%s1157_s2 + $0x8] sm:$0xff] %vm412_vm0, %v332_v50  ;;  %v149_v55 = vpop.permute.xlu1 %148  ;;  %v139_v56 = vpop.permute.xlu0 %138  ;;  %v79_v49 = vld [vmem:[%s1156_s1 + $0xe0] sm:$0xff]  ;;  %v80_v50 = vld [vmem:[%s1156_s1 + $0xe8] sm:$0xff] }
  0x86   :  { %v337_v57 = vmul.f32 %v149_v55, %v57_v51  ;;  %v338_v58 = vmul.f32 %v149_v55, %v58_v52  ;;  %v333_v59 = vmul.f32 %v139_v56, %v53_v53  ;;  %v334_v60 = vmul.f32 %v139_v56, %v54_v54 }
  0x88   :  { %418 = vst [vmem:[%s1157_s2 + $0x30] sm:$0xff] %v337_v57  ;;  %419 = vst.msk [vmem:[%s1157_s2 + $0x38] sm:$0xff] %vm412_vm0, %v338_v58  ;;  %v85_v57 = vld [vmem:[%s1156_s1 + $0x110] sm:$0xff]  ;;  %v86_v58 = vld [vmem:[%s1156_s1 + $0x118] sm:$0xff] }
  0x89   :  { %414 = vst [vmem:[%s1157_s2 + $0x10] sm:$0xff] %v333_v59  ;;  %415 = vst.msk [vmem:[%s1157_s2 + $0x18] sm:$0xff] %vm412_vm0, %v334_v60  ;;  %v159_v1 = vpop.permute.xlu1 %158  ;;  %v154_v2 = vpop.permute.xlu0 %153  ;;  %v83_v59 = vld [vmem:[%s1156_s1 + $0x100] sm:$0xff]  ;;  %v84_v60 = vld [vmem:[%s1156_s1 + $0x108] sm:$0xff] }
  0x8a   :  { %v341_v3 = vmul.f32 %v159_v1, %v61_v61  ;;  %v342_v4 = vmul.f32 %v159_v1, %v62_v62  ;;  %v339_v5 = vmul.f32 %v154_v2, %v59_v63  ;;  %v340_v6 = vmul.f32 %v154_v2, %v60_v0 }
  0x8c   :  { %422 = vst [vmem:[%s1157_s2 + $0x50] sm:$0xff] %v341_v3  ;;  %423 = vst.msk [vmem:[%s1157_s2 + $0x58] sm:$0xff] %vm412_vm0, %v342_v4  ;;  %v89_v3 = vld [vmem:[%s1156_s1 + $0x130] sm:$0xff]  ;;  %v90_v4 = vld [vmem:[%s1156_s1 + $0x138] sm:$0xff] }
  0x8d   :  { %420 = vst [vmem:[%s1157_s2 + $0x40] sm:$0xff] %v339_v5  ;;  %421 = vst.msk [vmem:[%s1157_s2 + $0x48] sm:$0xff] %vm412_vm0, %v340_v6  ;;  %v169_v11 = vpop.permute.xlu1 %168  ;;  %v164_v12 = vpop.permute.xlu0 %163  ;;  %v87_v5 = vld [vmem:[%s1156_s1 + $0x120] sm:$0xff]  ;;  %v88_v6 = vld [vmem:[%s1156_s1 + $0x128] sm:$0xff] }
  0x8e   :  { %v345_v13 = vmul.f32 %v169_v11, %v65_v7  ;;  %v346_v14 = vmul.f32 %v169_v11, %v66_v8  ;;  %v343_v15 = vmul.f32 %v164_v12, %v63_v9  ;;  %v344_v16 = vmul.f32 %v164_v12, %v64_v10 }
  0x90   :  { %426 = vst [vmem:[%s1157_s2 + $0x70] sm:$0xff] %v345_v13  ;;  %427 = vst.msk [vmem:[%s1157_s2 + $0x78] sm:$0xff] %vm412_vm0, %v346_v14  ;;  %v93_v13 = vld [vmem:[%s1156_s1 + $0x150] sm:$0xff]  ;;  %v94_v14 = vld [vmem:[%s1156_s1 + $0x158] sm:$0xff] }
  0x91   :  { %424 = vst [vmem:[%s1157_s2 + $0x60] sm:$0xff] %v343_v15  ;;  %425 = vst.msk [vmem:[%s1157_s2 + $0x68] sm:$0xff] %vm412_vm0, %v344_v16  ;;  %v179_v21 = vpop.permute.xlu1 %178  ;;  %v174_v22 = vpop.permute.xlu0 %173  ;;  %v91_v15 = vld [vmem:[%s1156_s1 + $0x140] sm:$0xff]  ;;  %v92_v16 = vld [vmem:[%s1156_s1 + $0x148] sm:$0xff] }
  0x92   :  { %v349_v23 = vmul.f32 %v179_v21, %v69_v17  ;;  %v350_v24 = vmul.f32 %v179_v21, %v70_v18  ;;  %v347_v25 = vmul.f32 %v174_v22, %v67_v19  ;;  %v348_v26 = vmul.f32 %v174_v22, %v68_v20 }
  0x94   :  { %430 = vst [vmem:[%s1157_s2 + $0x90] sm:$0xff] %v349_v23  ;;  %431 = vst.msk [vmem:[%s1157_s2 + $0x98] sm:$0xff] %vm412_vm0, %v350_v24  ;;  %v97_v23 = vld [vmem:[%s1156_s1 + $0x170] sm:$0xff]  ;;  %v98_v24 = vld [vmem:[%s1156_s1 + $0x178] sm:$0xff] }
  0x95   :  { %428 = vst [vmem:[%s1157_s2 + $0x80] sm:$0xff] %v347_v25  ;;  %429 = vst.msk [vmem:[%s1157_s2 + $0x88] sm:$0xff] %vm412_vm0, %v348_v26  ;;  %v189_v31 = vpop.permute.xlu1 %188  ;;  %v184_v32 = vpop.permute.xlu0 %183  ;;  %v95_v25 = vld [vmem:[%s1156_s1 + $0x160] sm:$0xff]  ;;  %v96_v26 = vld [vmem:[%s1156_s1 + $0x168] sm:$0xff] }
  0x96   :  { %v353_v33 = vmul.f32 %v189_v31, %v73_v27  ;;  %v354_v34 = vmul.f32 %v189_v31, %v74_v28  ;;  %v351_v35 = vmul.f32 %v184_v32, %v71_v29  ;;  %v352_v36 = vmul.f32 %v184_v32, %v72_v30 }
  0x98   :  { %434 = vst [vmem:[%s1157_s2 + $0xb0] sm:$0xff] %v353_v33  ;;  %435 = vst.msk [vmem:[%s1157_s2 + $0xb8] sm:$0xff] %vm412_vm0, %v354_v34  ;;  %v101_v33 = vld [vmem:[%s1156_s1 + $0x190] sm:$0xff]  ;;  %v102_v34 = vld [vmem:[%s1156_s1 + $0x198] sm:$0xff] }
  0x99   :  { %432 = vst [vmem:[%s1157_s2 + $0xa0] sm:$0xff] %v351_v35  ;;  %433 = vst.msk [vmem:[%s1157_s2 + $0xa8] sm:$0xff] %vm412_vm0, %v352_v36  ;;  %v199_v41 = vpop.permute.xlu1 %198  ;;  %v194_v42 = vpop.permute.xlu0 %193  ;;  %v99_v35 = vld [vmem:[%s1156_s1 + $0x180] sm:$0xff]  ;;  %v100_v36 = vld [vmem:[%s1156_s1 + $0x188] sm:$0xff] }
  0x9a   :  { %v357_v43 = vmul.f32 %v199_v41, %v77_v37  ;;  %v358_v44 = vmul.f32 %v199_v41, %v78_v38  ;;  %v355_v45 = vmul.f32 %v194_v42, %v75_v39  ;;  %v356_v46 = vmul.f32 %v194_v42, %v76_v40 }
  0x9c   :  { %438 = vst [vmem:[%s1157_s2 + $0xd0] sm:$0xff] %v357_v43  ;;  %439 = vst.msk [vmem:[%s1157_s2 + $0xd8] sm:$0xff] %vm412_vm0, %v358_v44  ;;  %v105_v43 = vld [vmem:[%s1156_s1 + $0x1b0] sm:$0xff]  ;;  %v106_v44 = vld [vmem:[%s1156_s1 + $0x1b8] sm:$0xff] }
  0x9d   :  { %436 = vst [vmem:[%s1157_s2 + $0xc0] sm:$0xff] %v355_v45  ;;  %437 = vst.msk [vmem:[%s1157_s2 + $0xc8] sm:$0xff] %vm412_vm0, %v356_v46  ;;  %v209_v51 = vpop.permute.xlu1 %208  ;;  %v204_v52 = vpop.permute.xlu0 %203  ;;  %v103_v45 = vld [vmem:[%s1156_s1 + $0x1a0] sm:$0xff]  ;;  %v104_v46 = vld [vmem:[%s1156_s1 + $0x1a8] sm:$0xff] }
  0x9e   :  { %v361_v53 = vmul.f32 %v209_v51, %v81_v47  ;;  %v362_v54 = vmul.f32 %v209_v51, %v82_v48  ;;  %v359_v55 = vmul.f32 %v204_v52, %v79_v49  ;;  %v360_v56 = vmul.f32 %v204_v52, %v80_v50 }
  0xa0   :  { %442 = vst [vmem:[%s1157_s2 + $0xf0] sm:$0xff] %v361_v53  ;;  %443 = vst.msk [vmem:[%s1157_s2 + $0xf8] sm:$0xff] %vm412_vm0, %v362_v54  ;;  %v109_v53 = vld [vmem:[%s1156_s1 + $0x1d0] sm:$0xff]  ;;  %v110_v54 = vld [vmem:[%s1156_s1 + $0x1d8] sm:$0xff] }
  0xa1   :  { %440 = vst [vmem:[%s1157_s2 + $0xe0] sm:$0xff] %v359_v55  ;;  %441 = vst.msk [vmem:[%s1157_s2 + $0xe8] sm:$0xff] %vm412_vm0, %v360_v56  ;;  %v219_v61 = vpop.permute.xlu1 %218  ;;  %v214_v62 = vpop.permute.xlu0 %213  ;;  %v107_v55 = vld [vmem:[%s1156_s1 + $0x1c0] sm:$0xff]  ;;  %v108_v56 = vld [vmem:[%s1156_s1 + $0x1c8] sm:$0xff] }
  0xa2   :  { %v365_v63 = vmul.f32 %v219_v61, %v85_v57  ;;  %v366_v0 = vmul.f32 %v219_v61, %v86_v58  ;;  %v363_v1 = vmul.f32 %v214_v62, %v83_v59  ;;  %v364_v2 = vmul.f32 %v214_v62, %v84_v60 }
  0xa4   :  { %446 = vst [vmem:[%s1157_s2 + $0x110] sm:$0xff] %v365_v63  ;;  %447 = vst.msk [vmem:[%s1157_s2 + $0x118] sm:$0xff] %vm412_vm0, %v366_v0  ;;  %v113_v63 = vld [vmem:[%s1156_s1 + $0x1f0] sm:$0xff]  ;;  %v114_v0 = vld [vmem:[%s1156_s1 + $0x1f8] sm:$0xff] }
  0xa5   :  { %444 = vst [vmem:[%s1157_s2 + $0x100] sm:$0xff] %v363_v1  ;;  %445 = vst.msk [vmem:[%s1157_s2 + $0x108] sm:$0xff] %vm412_vm0, %v364_v2  ;;  %v229_v7 = vpop.permute.xlu1 %228  ;;  %v224_v8 = vpop.permute.xlu0 %223  ;;  %v111_v1 = vld [vmem:[%s1156_s1 + $0x1e0] sm:$0xff]  ;;  %v112_v2 = vld [vmem:[%s1156_s1 + $0x1e8] sm:$0xff] }
  0xa6   :  { %v369_v9 = vmul.f32 %v229_v7, %v89_v3  ;;  %v370_v10 = vmul.f32 %v229_v7, %v90_v4  ;;  %v367_v11 = vmul.f32 %v224_v8, %v87_v5  ;;  %v368_v12 = vmul.f32 %v224_v8, %v88_v6 }
  0xa8   :  { %450 = vst [vmem:[%s1157_s2 + $0x130] sm:$0xff] %v369_v9  ;;  %451 = vst.msk [vmem:[%s1157_s2 + $0x138] sm:$0xff] %vm412_vm0, %v370_v10  ;;  %v117_v9 = vld [vmem:[%s1156_s1 + $0x210] sm:$0xff]  ;;  %v118_v10 = vld [vmem:[%s1156_s1 + $0x218] sm:$0xff] }
  0xa9   :  { %448 = vst [vmem:[%s1157_s2 + $0x120] sm:$0xff] %v367_v11  ;;  %449 = vst.msk [vmem:[%s1157_s2 + $0x128] sm:$0xff] %vm412_vm0, %v368_v12  ;;  %v239_v17 = vpop.permute.xlu1 %238  ;;  %v234_v18 = vpop.permute.xlu0 %233  ;;  %v115_v11 = vld [vmem:[%s1156_s1 + $0x200] sm:$0xff]  ;;  %v116_v12 = vld [vmem:[%s1156_s1 + $0x208] sm:$0xff] }
  0xaa   :  { %v373_v19 = vmul.f32 %v239_v17, %v93_v13  ;;  %v374_v20 = vmul.f32 %v239_v17, %v94_v14  ;;  %v371_v21 = vmul.f32 %v234_v18, %v91_v15  ;;  %v372_v22 = vmul.f32 %v234_v18, %v92_v16 }
  0xac   :  { %454 = vst [vmem:[%s1157_s2 + $0x150] sm:$0xff] %v373_v19  ;;  %455 = vst.msk [vmem:[%s1157_s2 + $0x158] sm:$0xff] %vm412_vm0, %v374_v20  ;;  %v121_v19 = vld [vmem:[%s1156_s1 + $0x230] sm:$0xff]  ;;  %v122_v20 = vld [vmem:[%s1156_s1 + $0x238] sm:$0xff] }
  0xad   :  { %452 = vst [vmem:[%s1157_s2 + $0x140] sm:$0xff] %v371_v21  ;;  %453 = vst.msk [vmem:[%s1157_s2 + $0x148] sm:$0xff] %vm412_vm0, %v372_v22  ;;  %v249_v27 = vpop.permute.xlu1 %248  ;;  %v244_v28 = vpop.permute.xlu0 %243  ;;  %v119_v21 = vld [vmem:[%s1156_s1 + $0x220] sm:$0xff]  ;;  %v120_v22 = vld [vmem:[%s1156_s1 + $0x228] sm:$0xff] }
  0xae   :  { %v377_v29 = vmul.f32 %v249_v27, %v97_v23  ;;  %v378_v30 = vmul.f32 %v249_v27, %v98_v24  ;;  %v375_v31 = vmul.f32 %v244_v28, %v95_v25  ;;  %v376_v32 = vmul.f32 %v244_v28, %v96_v26 }
  0xb0   :  { %458 = vst [vmem:[%s1157_s2 + $0x170] sm:$0xff] %v377_v29  ;;  %459 = vst.msk [vmem:[%s1157_s2 + $0x178] sm:$0xff] %vm412_vm0, %v378_v30  ;;  %v125_v29 = vld [vmem:[%s1156_s1 + $0x250] sm:$0xff]  ;;  %v126_v30 = vld [vmem:[%s1156_s1 + $0x258] sm:$0xff] }
  0xb1   :  { %456 = vst [vmem:[%s1157_s2 + $0x160] sm:$0xff] %v375_v31  ;;  %457 = vst.msk [vmem:[%s1157_s2 + $0x168] sm:$0xff] %vm412_vm0, %v376_v32  ;;  %v259_v37 = vpop.permute.xlu1 %258  ;;  %v254_v38 = vpop.permute.xlu0 %253  ;;  %v123_v31 = vld [vmem:[%s1156_s1 + $0x240] sm:$0xff]  ;;  %v124_v32 = vld [vmem:[%s1156_s1 + $0x248] sm:$0xff] }
  0xb2   :  { %v381_v39 = vmul.f32 %v259_v37, %v101_v33  ;;  %v382_v40 = vmul.f32 %v259_v37, %v102_v34  ;;  %v379_v41 = vmul.f32 %v254_v38, %v99_v35  ;;  %v380_v42 = vmul.f32 %v254_v38, %v100_v36 }
  0xb4   :  { %462 = vst [vmem:[%s1157_s2 + $0x190] sm:$0xff] %v381_v39  ;;  %463 = vst.msk [vmem:[%s1157_s2 + $0x198] sm:$0xff] %vm412_vm0, %v382_v40  ;;  %v129_v39 = vld [vmem:[%s1156_s1 + $0x270] sm:$0xff]  ;;  %v130_v40 = vld [vmem:[%s1156_s1 + $0x278] sm:$0xff] }
  0xb5   :  { %460 = vst [vmem:[%s1157_s2 + $0x180] sm:$0xff] %v379_v41  ;;  %461 = vst.msk [vmem:[%s1157_s2 + $0x188] sm:$0xff] %vm412_vm0, %v380_v42  ;;  %v269_v47 = vpop.permute.xlu1 %268  ;;  %v264_v48 = vpop.permute.xlu0 %263  ;;  %v127_v41 = vld [vmem:[%s1156_s1 + $0x260] sm:$0xff]  ;;  %v128_v42 = vld [vmem:[%s1156_s1 + $0x268] sm:$0xff] }
  0xb6   :  { %v385_v49 = vmul.f32 %v269_v47, %v105_v43  ;;  %v386_v50 = vmul.f32 %v269_v47, %v106_v44  ;;  %v383_v51 = vmul.f32 %v264_v48, %v103_v45  ;;  %v384_v52 = vmul.f32 %v264_v48, %v104_v46 }
  0xb8   :  { %466 = vst [vmem:[%s1157_s2 + $0x1b0] sm:$0xff] %v385_v49  ;;  %467 = vst.msk [vmem:[%s1157_s2 + $0x1b8] sm:$0xff] %vm412_vm0, %v386_v50 }
  0xb9   :  { %464 = vst [vmem:[%s1157_s2 + $0x1a0] sm:$0xff] %v383_v51  ;;  %465 = vst.msk [vmem:[%s1157_s2 + $0x1a8] sm:$0xff] %vm412_vm0, %v384_v52  ;;  %v279_v57 = vpop.permute.xlu1 %278  ;;  %v274_v58 = vpop.permute.xlu0 %273 }
  0xba   :  { %v389_v59 = vmul.f32 %v279_v57, %v109_v53  ;;  %v390_v60 = vmul.f32 %v279_v57, %v110_v54  ;;  %v387_v61 = vmul.f32 %v274_v58, %v107_v55  ;;  %v388_v62 = vmul.f32 %v274_v58, %v108_v56 }
  0xbc   :  { %470 = vst [vmem:[%s1157_s2 + $0x1d0] sm:$0xff] %v389_v59  ;;  %471 = vst.msk [vmem:[%s1157_s2 + $0x1d8] sm:$0xff] %vm412_vm0, %v390_v60 }
  0xbd   :  { %468 = vst [vmem:[%s1157_s2 + $0x1c0] sm:$0xff] %v387_v61  ;;  %469 = vst.msk [vmem:[%s1157_s2 + $0x1c8] sm:$0xff] %vm412_vm0, %v388_v62  ;;  %v289_v3 = vpop.permute.xlu1 %288  ;;  %v284_v4 = vpop.permute.xlu0 %283 }
  0xbe   :  { %v393_v5 = vmul.f32 %v289_v3, %v113_v63  ;;  %v394_v6 = vmul.f32 %v289_v3, %v114_v0  ;;  %v391_v7 = vmul.f32 %v284_v4, %v111_v1  ;;  %v392_v8 = vmul.f32 %v284_v4, %v112_v2 }
  0xc0   :  { %474 = vst [vmem:[%s1157_s2 + $0x1f0] sm:$0xff] %v393_v5  ;;  %475 = vst.msk [vmem:[%s1157_s2 + $0x1f8] sm:$0xff] %vm412_vm0, %v394_v6 }
  0xc1   :  { %472 = vst [vmem:[%s1157_s2 + $0x1e0] sm:$0xff] %v391_v7  ;;  %473 = vst.msk [vmem:[%s1157_s2 + $0x1e8] sm:$0xff] %vm412_vm0, %v392_v8  ;;  %v299_v13 = vpop.permute.xlu1 %298  ;;  %v294_v14 = vpop.permute.xlu0 %293 }
  0xc2   :  { %v397_v15 = vmul.f32 %v299_v13, %v117_v9  ;;  %v398_v16 = vmul.f32 %v299_v13, %v118_v10  ;;  %v395_v17 = vmul.f32 %v294_v14, %v115_v11  ;;  %v396_v18 = vmul.f32 %v294_v14, %v116_v12 }
  0xc4   :  { %478 = vst [vmem:[%s1157_s2 + $0x210] sm:$0xff] %v397_v15  ;;  %479 = vst.msk [vmem:[%s1157_s2 + $0x218] sm:$0xff] %vm412_vm0, %v398_v16 }
  0xc5   :  { %476 = vst [vmem:[%s1157_s2 + $0x200] sm:$0xff] %v395_v17  ;;  %477 = vst.msk [vmem:[%s1157_s2 + $0x208] sm:$0xff] %vm412_vm0, %v396_v18  ;;  %v309_v23 = vpop.permute.xlu1 %308  ;;  %v304_v24 = vpop.permute.xlu0 %303 }
  0xc6   :  { %v401_v25 = vmul.f32 %v309_v23, %v121_v19  ;;  %v402_v26 = vmul.f32 %v309_v23, %v122_v20  ;;  %v399_v27 = vmul.f32 %v304_v24, %v119_v21  ;;  %v400_v28 = vmul.f32 %v304_v24, %v120_v22 }
  0xc8   :  { %482 = vst [vmem:[%s1157_s2 + $0x230] sm:$0xff] %v401_v25  ;;  %483 = vst.msk [vmem:[%s1157_s2 + $0x238] sm:$0xff] %vm412_vm0, %v402_v26 }
  0xc9   :  { %480 = vst [vmem:[%s1157_s2 + $0x220] sm:$0xff] %v399_v27  ;;  %481 = vst.msk [vmem:[%s1157_s2 + $0x228] sm:$0xff] %vm412_vm0, %v400_v28  ;;  %v319_v33 = vpop.permute.xlu1 %318  ;;  %v314_v34 = vpop.permute.xlu0 %313 }
  0xca   :  { %v405_v35 = vmul.f32 %v319_v33, %v125_v29  ;;  %v406_v36 = vmul.f32 %v319_v33, %v126_v30  ;;  %v403_v37 = vmul.f32 %v314_v34, %v123_v31  ;;  %v404_v38 = vmul.f32 %v314_v34, %v124_v32 }
  0xcc   :  { %486 = vst [vmem:[%s1157_s2 + $0x250] sm:$0xff] %v405_v35  ;;  %487 = vst.msk [vmem:[%s1157_s2 + $0x258] sm:$0xff] %vm412_vm0, %v406_v36 }
  0xcd   :  { %484 = vst [vmem:[%s1157_s2 + $0x240] sm:$0xff] %v403_v37  ;;  %485 = vst.msk [vmem:[%s1157_s2 + $0x248] sm:$0xff] %vm412_vm0, %v404_v38  ;;  %v329_v43 = vpop.permute.xlu1 %328  ;;  %v324_v44 = vpop.permute.xlu0 %323 }
  0xce   :  { %v409_v45 = vmul.f32 %v329_v43, %v129_v39  ;;  %v410_v46 = vmul.f32 %v329_v43, %v130_v40  ;;  %v407_v47 = vmul.f32 %v324_v44, %v127_v41  ;;  %v408_v48 = vmul.f32 %v324_v44, %v128_v42 }
  0xd0   :  { %490 = vst [vmem:[%s1157_s2 + $0x270] sm:$0xff] %v409_v45  ;;  %491 = vst.msk [vmem:[%s1157_s2 + $0x278] sm:$0xff] %vm412_vm0, %v410_v46 }
  0xd1   :  { %488 = vst [vmem:[%s1157_s2 + $0x260] sm:$0xff] %v407_v47  ;;  %489 = vst.msk [vmem:[%s1157_s2 + $0x268] sm:$0xff] %vm412_vm0, %v408_v48 }

</bundles_post_ra>
